<compile_context>
chip_gen: v7x
topology: tpu7x:2x2x1
jax: 0.10.0
libtpu: 0.0.40
codegen_flags: <defaults>
</compile_context>

<pallas_src>
import jax
import jax.numpy as jnp
from jax.experimental import pallas as pl
from jax.experimental.pallas import tpu as pltpu


def deepnn_kernel(xt_ref, w1_ref, b1_ref, w2_ref, b2_ref, w3_ref, b3_ref, ot_ref):
    # All tiles are (features, TB): features on sublanes, batch on the 128-wide
    # lane axis. Each layer is an unrolled VPU multiply-accumulate:
    #   acc[o, b] = sum_i w[o, i] * a[i, b] + bias[o]
    # w[:, i:i+1] broadcasts along lanes, a[i:i+1, :] broadcasts along sublanes,
    # so no MXU push/pop is involved and no cross-column data movement happens.
    def dense(w_ref, b_ref, a):
        w = w_ref[...]                                   # (out, in), tiny
        k = w.shape[1]
        acc = w[:, 0:1] * a[0:1, :] + b_ref[...]         # (out, TB)
        for i in range(1, k):                            # static unroll
            acc = acc + w[:, i:i+1] * a[i:i+1, :]
        return acc

    x = xt_ref[...]                                      # (4,  TB) f32
    h1 = jnp.maximum(dense(w1_ref, b1_ref, x), 0.0)      # (16, TB)
    h2 = jnp.maximum(dense(w2_ref, b2_ref, h1), 0.0)     # (8,  TB)
    y = dense(w3_ref, b3_ref, h2)                        # (2,  TB)
    ot_ref[...] = y.astype(ot_ref.dtype)


def deepnn_forward_t(xt, params, *, block_b=None):
    """Fast path. xt: (n_in, B) float32 (batch on trailing axis).
    Returns (n_out, B). No wrapper-side transposes; pads only if B is not a
    multiple of the batch tile."""
    n_in, B = xt.shape
    n_out = params["w3"].shape[0]

    if block_b is None:
        # Aim for >= 8 grid steps (pipelining + v7x megacore sharding), cap the
        # tile at 2048 lanes, floor at one 128-lane vreg width.
        tgt = pl.cdiv(B, 8)
        block_b = max(128, min(2048, pl.cdiv(tgt, 128) * 128))
    assert block_b % 128 == 0

    n_steps = pl.cdiv(B, block_b)
    B_pad = n_steps * block_b
    if B_pad != B:
        # Small tail pad (< block_b columns); padded columns are dropped below.
        xt = jnp.pad(xt, ((0, 0), (0, B_pad - B)))

    # Weights/biases: whole array as one block with a constant index_map, so
    # they are DMA'd once and stay VMEM-resident across all grid steps.
    resident = lambda a: pl.BlockSpec(a.shape, lambda i: (0, 0))

    out_t = pl.pallas_call(
        deepnn_kernel,
        out_shape=jax.ShapeDtypeStruct((n_out, B_pad), jnp.float32),
        grid_spec=pltpu.PrefetchScalarGridSpec(
            num_scalar_prefetch=0,
            grid=(n_steps,),
            in_specs=[
                pl.BlockSpec((n_in, block_b), lambda i: (0, i)),   # x^T tiles
                resident(params["w1"]), resident(params["b1"]),
                resident(params["w2"]), resident(params["b2"]),
                resident(params["w3"]), resident(params["b3"]),
            ],
            out_specs=pl.BlockSpec((n_out, block_b), lambda i: (0, i)),
        ),
        compiler_params=pltpu.CompilerParams(
            dimension_semantics=("parallel",),       # megacore sharding on v7x
            vmem_limit_bytes=16 * 1024 * 1024,       # working set << 1 MiB
        ),
    )(xt, params["w1"], params["b1"], params["w2"], params["b2"],
      params["w3"], params["b3"])

    if B_pad != B:
        out_t = out_t[:, :B]
    return out_t


def deepnn_forward(x, params, *, block_b=None):
    """Module-semantics wrapper: x (B, n_inputs) -> (B, n_outputs).
    The transposes here are layout-compat shims only; producers/consumers that
    can hold data batch-on-trailing-axis should call deepnn_forward_t."""
    return deepnn_forward_t(x.T, params, block_b=block_b).T


def init_params(key, n_inputs=4, n_outputs=2):
    """Deterministic init matching nn.Linear: W (out, in), b (out, 1)."""
    ks = jax.random.split(key, 6)

    def linear(kw, kb, fan_in, fan_out):
        bound = 1.0 / jnp.sqrt(fan_in)
        w = jax.random.uniform(kw, (fan_out, fan_in), jnp.float32, -bound, bound)
        b = jax.random.uniform(kb, (fan_out, 1), jnp.float32, -bound, bound)
        return w, b

    w1, b1 = linear(ks[0], ks[1], n_inputs, 16)
    w2, b2 = linear(ks[2], ks[3], 16, 8)
    w3, b3 = linear(ks[4], ks[5], 8, n_outputs)
    return {"w1": w1, "b1": b1, "w2": w2, "b2": b2, "w3": w3, "b3": b3}


def deepnn_ref(x, p):
    h1 = jnp.maximum(x @ p["w1"].T + p["b1"].T, 0.0)
    h2 = jnp.maximum(h1 @ p["w2"].T + p["b2"].T, 0.0)
    return h2 @ p["w3"].T + p["b3"].T


if __name__ == "__main__":
    key = jax.random.PRNGKey(0)
    k_x, k_x2, k_p = jax.random.split(key, 3)

    B, n_inputs, n_outputs = 8, 4, 2
    params = init_params(k_p, n_inputs, n_outputs)

    # Small batch (single grid step, tail-padding path), module-semantics API.
    x = jax.random.normal(k_x, (B, n_inputs), jnp.float32)
    out = jax.block_until_ready(deepnn_forward(x, params))
    ref = deepnn_ref(x, params)
    assert out.shape == (B, n_outputs)
    assert jnp.allclose(out, ref, atol=1e-4, rtol=1e-4)

    # Batch exercising multiple grid steps + a ragged tail (default heuristic
    # picks a 128-lane tile -> 3 steps here).
    B2 = 300
    x2 = jax.random.normal(k_x2, (B2, n_inputs), jnp.float32)
    out2 = jax.block_until_ready(deepnn_forward(x2, params))
    ref2 = deepnn_ref(x2, params)
    assert out2.shape == (B2, n_outputs)
    assert jnp.allclose(out2, ref2, atol=1e-4, rtol=1e-4)

    # Transposed fast path (no wrapper transposes around the kernel).
    out2_t = jax.block_until_ready(deepnn_forward_t(x2.T, params, block_b=128))
    assert out2_t.shape == (n_outputs, B2)
    assert jnp.allclose(out2_t.T, ref2, atol=1e-4, rtol=1e-4)

    print("KERNEL_OK")
</pallas_src>

<mosaic_0001>
module attributes {stable_mosaic.version = 11 : i64} {
  func.func @deepnn_kernel(%arg0: i32, %arg1: memref<4x128xf32, #tpu.memory_space<vmem>>, %arg2: memref<16x4xf32, #tpu.memory_space<vmem>>, %arg3: memref<16x1xf32, #tpu.memory_space<vmem>>, %arg4: memref<8x16xf32, #tpu.memory_space<vmem>>, %arg5: memref<8x1xf32, #tpu.memory_space<vmem>>, %arg6: memref<2x8xf32, #tpu.memory_space<vmem>>, %arg7: memref<2x1xf32, #tpu.memory_space<vmem>>, %arg8: memref<2x128xf32, #tpu.memory_space<vmem>>) attributes {dimension_semantics = [#tpu.dimension_semantics<parallel>], iteration_bounds = array<i64: 1>, scalar_prefetch = 0 : i64, scratch_operands = 0 : i64, tpu.core_type = #tpu.core_type<tc>, window_params = [{transform_indices = @transform_0, window_bounds = array<i64: 4, 128>}, {pipeline_mode = #tpu.pipeline_mode<synchronous>, transform_indices = @transform_1, window_bounds = array<i64: 16, 4>}, {pipeline_mode = #tpu.pipeline_mode<synchronous>, transform_indices = @transform_2, window_bounds = array<i64: 16, 1>}, {pipeline_mode = #tpu.pipeline_mode<synchronous>, transform_indices = @transform_3, window_bounds = array<i64: 8, 16>}, {pipeline_mode = #tpu.pipeline_mode<synchronous>, transform_indices = @transform_4, window_bounds = array<i64: 8, 1>}, {pipeline_mode = #tpu.pipeline_mode<synchronous>, transform_indices = @transform_5, window_bounds = array<i64: 2, 8>}, {pipeline_mode = #tpu.pipeline_mode<synchronous>, transform_indices = @transform_6, window_bounds = array<i64: 2, 1>}, {transform_indices = @transform_7, window_bounds = array<i64: 2, 128>}]} {
    %c0 = arith.constant 0 : index
    %c0_0 = arith.constant 0 : index
    %0 = vector.load %arg1[%c0, %c0_0] : memref<4x128xf32, #tpu.memory_space<vmem>>, vector<4x128xf32>
    %c0_1 = arith.constant 0 : index
    %c0_2 = arith.constant 0 : index
    %1 = vector.load %arg2[%c0_1, %c0_2] : memref<16x4xf32, #tpu.memory_space<vmem>>, vector<16x4xf32>
    %2 = vector.extract_strided_slice %1 {offsets = [0, 0], sizes = [16, 1], strides = [1, 1]} : vector<16x4xf32> to vector<16x1xf32>
    %3 = vector.extract_strided_slice %0 {offsets = [0, 0], sizes = [1, 128], strides = [1, 1]} : vector<4x128xf32> to vector<1x128xf32>
    %4 = vector.broadcast %2 : vector<16x1xf32> to vector<16x128xf32>
    %5 = vector.broadcast %3 : vector<1x128xf32> to vector<16x128xf32>
    %6 = arith.mulf %4, %5 : vector<16x128xf32>
    %c0_3 = arith.constant 0 : index
    %c0_4 = arith.constant 0 : index
    %7 = vector.load %arg3[%c0_3, %c0_4] : memref<16x1xf32, #tpu.memory_space<vmem>>, vector<16x1xf32>
    %8 = vector.broadcast %7 : vector<16x1xf32> to vector<16x128xf32>
    %9 = arith.addf %6, %8 : vector<16x128xf32>
    %10 = vector.extract_strided_slice %1 {offsets = [0, 1], sizes = [16, 1], strides = [1, 1]} : vector<16x4xf32> to vector<16x1xf32>
    %11 = vector.extract_strided_slice %0 {offsets = [1, 0], sizes = [1, 128], strides = [1, 1]} : vector<4x128xf32> to vector<1x128xf32>
    %12 = vector.broadcast %10 : vector<16x1xf32> to vector<16x128xf32>
    %13 = vector.broadcast %11 : vector<1x128xf32> to vector<16x128xf32>
    %14 = arith.mulf %12, %13 : vector<16x128xf32>
    %15 = arith.addf %9, %14 : vector<16x128xf32>
    %16 = vector.extract_strided_slice %1 {offsets = [0, 2], sizes = [16, 1], strides = [1, 1]} : vector<16x4xf32> to vector<16x1xf32>
    %17 = vector.extract_strided_slice %0 {offsets = [2, 0], sizes = [1, 128], strides = [1, 1]} : vector<4x128xf32> to vector<1x128xf32>
    %18 = vector.broadcast %16 : vector<16x1xf32> to vector<16x128xf32>
    %19 = vector.broadcast %17 : vector<1x128xf32> to vector<16x128xf32>
    %20 = arith.mulf %18, %19 : vector<16x128xf32>
    %21 = arith.addf %15, %20 : vector<16x128xf32>
    %22 = vector.extract_strided_slice %1 {offsets = [0, 3], sizes = [16, 1], strides = [1, 1]} : vector<16x4xf32> to vector<16x1xf32>
    %23 = vector.extract_strided_slice %0 {offsets = [3, 0], sizes = [1, 128], strides = [1, 1]} : vector<4x128xf32> to vector<1x128xf32>
    %24 = vector.broadcast %22 : vector<16x1xf32> to vector<16x128xf32>
    %25 = vector.broadcast %23 : vector<1x128xf32> to vector<16x128xf32>
    %26 = arith.mulf %24, %25 : vector<16x128xf32>
    %27 = arith.addf %21, %26 : vector<16x128xf32>
    %cst = arith.constant 0.000000e+00 : f32
    %28 = vector.broadcast %cst : f32 to vector<16x128xf32>
    %29 = arith.maximumf %27, %28 : vector<16x128xf32>
    %c0_5 = arith.constant 0 : index
    %c0_6 = arith.constant 0 : index
    %30 = vector.load %arg4[%c0_5, %c0_6] : memref<8x16xf32, #tpu.memory_space<vmem>>, vector<8x16xf32>
    %31 = vector.extract_strided_slice %30 {offsets = [0, 0], sizes = [8, 1], strides = [1, 1]} : vector<8x16xf32> to vector<8x1xf32>
    %32 = vector.extract_strided_slice %29 {offsets = [0, 0], sizes = [1, 128], strides = [1, 1]} : vector<16x128xf32> to vector<1x128xf32>
    %33 = vector.broadcast %31 : vector<8x1xf32> to vector<8x128xf32>
    %34 = vector.broadcast %32 : vector<1x128xf32> to vector<8x128xf32>
    %35 = arith.mulf %33, %34 : vector<8x128xf32>
    %c0_7 = arith.constant 0 : index
    %c0_8 = arith.constant 0 : index
    %36 = vector.load %arg5[%c0_7, %c0_8] : memref<8x1xf32, #tpu.memory_space<vmem>>, vector<8x1xf32>
    %37 = vector.broadcast %36 : vector<8x1xf32> to vector<8x128xf32>
    %38 = arith.addf %35, %37 : vector<8x128xf32>
    %39 = vector.extract_strided_slice %30 {offsets = [0, 1], sizes = [8, 1], strides = [1, 1]} : vector<8x16xf32> to vector<8x1xf32>
    %40 = vector.extract_strided_slice %29 {offsets = [1, 0], sizes = [1, 128], strides = [1, 1]} : vector<16x128xf32> to vector<1x128xf32>
    %41 = vector.broadcast %39 : vector<8x1xf32> to vector<8x128xf32>
    %42 = vector.broadcast %40 : vector<1x128xf32> to vector<8x128xf32>
    %43 = arith.mulf %41, %42 : vector<8x128xf32>
    %44 = arith.addf %38, %43 : vector<8x128xf32>
    %45 = vector.extract_strided_slice %30 {offsets = [0, 2], sizes = [8, 1], strides = [1, 1]} : vector<8x16xf32> to vector<8x1xf32>
    %46 = vector.extract_strided_slice %29 {offsets = [2, 0], sizes = [1, 128], strides = [1, 1]} : vector<16x128xf32> to vector<1x128xf32>
    %47 = vector.broadcast %45 : vector<8x1xf32> to vector<8x128xf32>
    %48 = vector.broadcast %46 : vector<1x128xf32> to vector<8x128xf32>
    %49 = arith.mulf %47, %48 : vector<8x128xf32>
    %50 = arith.addf %44, %49 : vector<8x128xf32>
    %51 = vector.extract_strided_slice %30 {offsets = [0, 3], sizes = [8, 1], strides = [1, 1]} : vector<8x16xf32> to vector<8x1xf32>
    %52 = vector.extract_strided_slice %29 {offsets = [3, 0], sizes = [1, 128], strides = [1, 1]} : vector<16x128xf32> to vector<1x128xf32>
    %53 = vector.broadcast %51 : vector<8x1xf32> to vector<8x128xf32>
    %54 = vector.broadcast %52 : vector<1x128xf32> to vector<8x128xf32>
    %55 = arith.mulf %53, %54 : vector<8x128xf32>
    %56 = arith.addf %50, %55 : vector<8x128xf32>
    %57 = vector.extract_strided_slice %30 {offsets = [0, 4], sizes = [8, 1], strides = [1, 1]} : vector<8x16xf32> to vector<8x1xf32>
    %58 = vector.extract_strided_slice %29 {offsets = [4, 0], sizes = [1, 128], strides = [1, 1]} : vector<16x128xf32> to vector<1x128xf32>
    %59 = vector.broadcast %57 : vector<8x1xf32> to vector<8x128xf32>
    %60 = vector.broadcast %58 : vector<1x128xf32> to vector<8x128xf32>
    %61 = arith.mulf %59, %60 : vector<8x128xf32>
    %62 = arith.addf %56, %61 : vector<8x128xf32>
    %63 = vector.extract_strided_slice %30 {offsets = [0, 5], sizes = [8, 1], strides = [1, 1]} : vector<8x16xf32> to vector<8x1xf32>
    %64 = vector.extract_strided_slice %29 {offsets = [5, 0], sizes = [1, 128], strides = [1, 1]} : vector<16x128xf32> to vector<1x128xf32>
    %65 = vector.broadcast %63 : vector<8x1xf32> to vector<8x128xf32>
    %66 = vector.broadcast %64 : vector<1x128xf32> to vector<8x128xf32>
    %67 = arith.mulf %65, %66 : vector<8x128xf32>
    %68 = arith.addf %62, %67 : vector<8x128xf32>
    %69 = vector.extract_strided_slice %30 {offsets = [0, 6], sizes = [8, 1], strides = [1, 1]} : vector<8x16xf32> to vector<8x1xf32>
    %70 = vector.extract_strided_slice %29 {offsets = [6, 0], sizes = [1, 128], strides = [1, 1]} : vector<16x128xf32> to vector<1x128xf32>
    %71 = vector.broadcast %69 : vector<8x1xf32> to vector<8x128xf32>
    %72 = vector.broadcast %70 : vector<1x128xf32> to vector<8x128xf32>
    %73 = arith.mulf %71, %72 : vector<8x128xf32>
    %74 = arith.addf %68, %73 : vector<8x128xf32>
    %75 = vector.extract_strided_slice %30 {offsets = [0, 7], sizes = [8, 1], strides = [1, 1]} : vector<8x16xf32> to vector<8x1xf32>
    %76 = vector.extract_strided_slice %29 {offsets = [7, 0], sizes = [1, 128], strides = [1, 1]} : vector<16x128xf32> to vector<1x128xf32>
    %77 = vector.broadcast %75 : vector<8x1xf32> to vector<8x128xf32>
    %78 = vector.broadcast %76 : vector<1x128xf32> to vector<8x128xf32>
    %79 = arith.mulf %77, %78 : vector<8x128xf32>
    %80 = arith.addf %74, %79 : vector<8x128xf32>
    %81 = vector.extract_strided_slice %30 {offsets = [0, 8], sizes = [8, 1], strides = [1, 1]} : vector<8x16xf32> to vector<8x1xf32>
    %82 = vector.extract_strided_slice %29 {offsets = [8, 0], sizes = [1, 128], strides = [1, 1]} : vector<16x128xf32> to vector<1x128xf32>
    %83 = vector.broadcast %81 : vector<8x1xf32> to vector<8x128xf32>
    %84 = vector.broadcast %82 : vector<1x128xf32> to vector<8x128xf32>
    %85 = arith.mulf %83, %84 : vector<8x128xf32>
    %86 = arith.addf %80, %85 : vector<8x128xf32>
    %87 = vector.extract_strided_slice %30 {offsets = [0, 9], sizes = [8, 1], strides = [1, 1]} : vector<8x16xf32> to vector<8x1xf32>
    %88 = vector.extract_strided_slice %29 {offsets = [9, 0], sizes = [1, 128], strides = [1, 1]} : vector<16x128xf32> to vector<1x128xf32>
    %89 = vector.broadcast %87 : vector<8x1xf32> to vector<8x128xf32>
    %90 = vector.broadcast %88 : vector<1x128xf32> to vector<8x128xf32>
    %91 = arith.mulf %89, %90 : vector<8x128xf32>
    %92 = arith.addf %86, %91 : vector<8x128xf32>
    %93 = vector.extract_strided_slice %30 {offsets = [0, 10], sizes = [8, 1], strides = [1, 1]} : vector<8x16xf32> to vector<8x1xf32>
    %94 = vector.extract_strided_slice %29 {offsets = [10, 0], sizes = [1, 128], strides = [1, 1]} : vector<16x128xf32> to vector<1x128xf32>
    %95 = vector.broadcast %93 : vector<8x1xf32> to vector<8x128xf32>
    %96 = vector.broadcast %94 : vector<1x128xf32> to vector<8x128xf32>
    %97 = arith.mulf %95, %96 : vector<8x128xf32>
    %98 = arith.addf %92, %97 : vector<8x128xf32>
    %99 = vector.extract_strided_slice %30 {offsets = [0, 11], sizes = [8, 1], strides = [1, 1]} : vector<8x16xf32> to vector<8x1xf32>
    %100 = vector.extract_strided_slice %29 {offsets = [11, 0], sizes = [1, 128], strides = [1, 1]} : vector<16x128xf32> to vector<1x128xf32>
    %101 = vector.broadcast %99 : vector<8x1xf32> to vector<8x128xf32>
    %102 = vector.broadcast %100 : vector<1x128xf32> to vector<8x128xf32>
    %103 = arith.mulf %101, %102 : vector<8x128xf32>
    %104 = arith.addf %98, %103 : vector<8x128xf32>
    %105 = vector.extract_strided_slice %30 {offsets = [0, 12], sizes = [8, 1], strides = [1, 1]} : vector<8x16xf32> to vector<8x1xf32>
    %106 = vector.extract_strided_slice %29 {offsets = [12, 0], sizes = [1, 128], strides = [1, 1]} : vector<16x128xf32> to vector<1x128xf32>
    %107 = vector.broadcast %105 : vector<8x1xf32> to vector<8x128xf32>
    %108 = vector.broadcast %106 : vector<1x128xf32> to vector<8x128xf32>
    %109 = arith.mulf %107, %108 : vector<8x128xf32>
    %110 = arith.addf %104, %109 : vector<8x128xf32>
    %111 = vector.extract_strided_slice %30 {offsets = [0, 13], sizes = [8, 1], strides = [1, 1]} : vector<8x16xf32> to vector<8x1xf32>
    %112 = vector.extract_strided_slice %29 {offsets = [13, 0], sizes = [1, 128], strides = [1, 1]} : vector<16x128xf32> to vector<1x128xf32>
    %113 = vector.broadcast %111 : vector<8x1xf32> to vector<8x128xf32>
    %114 = vector.broadcast %112 : vector<1x128xf32> to vector<8x128xf32>
    %115 = arith.mulf %113, %114 : vector<8x128xf32>
    %116 = arith.addf %110, %115 : vector<8x128xf32>
    %117 = vector.extract_strided_slice %30 {offsets = [0, 14], sizes = [8, 1], strides = [1, 1]} : vector<8x16xf32> to vector<8x1xf32>
    %118 = vector.extract_strided_slice %29 {offsets = [14, 0], sizes = [1, 128], strides = [1, 1]} : vector<16x128xf32> to vector<1x128xf32>
    %119 = vector.broadcast %117 : vector<8x1xf32> to vector<8x128xf32>
    %120 = vector.broadcast %118 : vector<1x128xf32> to vector<8x128xf32>
    %121 = arith.mulf %119, %120 : vector<8x128xf32>
    %122 = arith.addf %116, %121 : vector<8x128xf32>
    %123 = vector.extract_strided_slice %30 {offsets = [0, 15], sizes = [8, 1], strides = [1, 1]} : vector<8x16xf32> to vector<8x1xf32>
    %124 = vector.extract_strided_slice %29 {offsets = [15, 0], sizes = [1, 128], strides = [1, 1]} : vector<16x128xf32> to vector<1x128xf32>
    %125 = vector.broadcast %123 : vector<8x1xf32> to vector<8x128xf32>
    %126 = vector.broadcast %124 : vector<1x128xf32> to vector<8x128xf32>
    %127 = arith.mulf %125, %126 : vector<8x128xf32>
    %128 = arith.addf %122, %127 : vector<8x128xf32>
    %cst_9 = arith.constant 0.000000e+00 : f32
    %129 = vector.broadcast %cst_9 : f32 to vector<8x128xf32>
    %130 = arith.maximumf %128, %129 : vector<8x128xf32>
    %c0_10 = arith.constant 0 : index
    %c0_11 = arith.constant 0 : index
    %131 = vector.load %arg6[%c0_10, %c0_11] : memref<2x8xf32, #tpu.memory_space<vmem>>, vector<2x8xf32>
    %132 = vector.extract_strided_slice %131 {offsets = [0, 0], sizes = [2, 1], strides = [1, 1]} : vector<2x8xf32> to vector<2x1xf32>
    %133 = vector.extract_strided_slice %130 {offsets = [0, 0], sizes = [1, 128], strides = [1, 1]} : vector<8x128xf32> to vector<1x128xf32>
    %134 = vector.broadcast %132 : vector<2x1xf32> to vector<2x128xf32>
    %135 = vector.broadcast %133 : vector<1x128xf32> to vector<2x128xf32>
    %136 = arith.mulf %134, %135 : vector<2x128xf32>
    %c0_12 = arith.constant 0 : index
    %c0_13 = arith.constant 0 : index
    %137 = vector.load %arg7[%c0_12, %c0_13] : memref<2x1xf32, #tpu.memory_space<vmem>>, vector<2x1xf32>
    %138 = vector.broadcast %137 : vector<2x1xf32> to vector<2x128xf32>
    %139 = arith.addf %136, %138 : vector<2x128xf32>
    %140 = vector.extract_strided_slice %131 {offsets = [0, 1], sizes = [2, 1], strides = [1, 1]} : vector<2x8xf32> to vector<2x1xf32>
    %141 = vector.extract_strided_slice %130 {offsets = [1, 0], sizes = [1, 128], strides = [1, 1]} : vector<8x128xf32> to vector<1x128xf32>
    %142 = vector.broadcast %140 : vector<2x1xf32> to vector<2x128xf32>
    %143 = vector.broadcast %141 : vector<1x128xf32> to vector<2x128xf32>
    %144 = arith.mulf %142, %143 : vector<2x128xf32>
    %145 = arith.addf %139, %144 : vector<2x128xf32>
    %146 = vector.extract_strided_slice %131 {offsets = [0, 2], sizes = [2, 1], strides = [1, 1]} : vector<2x8xf32> to vector<2x1xf32>
    %147 = vector.extract_strided_slice %130 {offsets = [2, 0], sizes = [1, 128], strides = [1, 1]} : vector<8x128xf32> to vector<1x128xf32>
    %148 = vector.broadcast %146 : vector<2x1xf32> to vector<2x128xf32>
    %149 = vector.broadcast %147 : vector<1x128xf32> to vector<2x128xf32>
    %150 = arith.mulf %148, %149 : vector<2x128xf32>
    %151 = arith.addf %145, %150 : vector<2x128xf32>
    %152 = vector.extract_strided_slice %131 {offsets = [0, 3], sizes = [2, 1], strides = [1, 1]} : vector<2x8xf32> to vector<2x1xf32>
    %153 = vector.extract_strided_slice %130 {offsets = [3, 0], sizes = [1, 128], strides = [1, 1]} : vector<8x128xf32> to vector<1x128xf32>
    %154 = vector.broadcast %152 : vector<2x1xf32> to vector<2x128xf32>
    %155 = vector.broadcast %153 : vector<1x128xf32> to vector<2x128xf32>
    %156 = arith.mulf %154, %155 : vector<2x128xf32>
    %157 = arith.addf %151, %156 : vector<2x128xf32>
    %158 = vector.extract_strided_slice %131 {offsets = [0, 4], sizes = [2, 1], strides = [1, 1]} : vector<2x8xf32> to vector<2x1xf32>
    %159 = vector.extract_strided_slice %130 {offsets = [4, 0], sizes = [1, 128], strides = [1, 1]} : vector<8x128xf32> to vector<1x128xf32>
    %160 = vector.broadcast %158 : vector<2x1xf32> to vector<2x128xf32>
    %161 = vector.broadcast %159 : vector<1x128xf32> to vector<2x128xf32>
    %162 = arith.mulf %160, %161 : vector<2x128xf32>
    %163 = arith.addf %157, %162 : vector<2x128xf32>
    %164 = vector.extract_strided_slice %131 {offsets = [0, 5], sizes = [2, 1], strides = [1, 1]} : vector<2x8xf32> to vector<2x1xf32>
    %165 = vector.extract_strided_slice %130 {offsets = [5, 0], sizes = [1, 128], strides = [1, 1]} : vector<8x128xf32> to vector<1x128xf32>
    %166 = vector.broadcast %164 : vector<2x1xf32> to vector<2x128xf32>
    %167 = vector.broadcast %165 : vector<1x128xf32> to vector<2x128xf32>
    %168 = arith.mulf %166, %167 : vector<2x128xf32>
    %169 = arith.addf %163, %168 : vector<2x128xf32>
    %170 = vector.extract_strided_slice %131 {offsets = [0, 6], sizes = [2, 1], strides = [1, 1]} : vector<2x8xf32> to vector<2x1xf32>
    %171 = vector.extract_strided_slice %130 {offsets = [6, 0], sizes = [1, 128], strides = [1, 1]} : vector<8x128xf32> to vector<1x128xf32>
    %172 = vector.broadcast %170 : vector<2x1xf32> to vector<2x128xf32>
    %173 = vector.broadcast %171 : vector<1x128xf32> to vector<2x128xf32>
    %174 = arith.mulf %172, %173 : vector<2x128xf32>
    %175 = arith.addf %169, %174 : vector<2x128xf32>
    %176 = vector.extract_strided_slice %131 {offsets = [0, 7], sizes = [2, 1], strides = [1, 1]} : vector<2x8xf32> to vector<2x1xf32>
    %177 = vector.extract_strided_slice %130 {offsets = [7, 0], sizes = [1, 128], strides = [1, 1]} : vector<8x128xf32> to vector<1x128xf32>
    %178 = vector.broadcast %176 : vector<2x1xf32> to vector<2x128xf32>
    %179 = vector.broadcast %177 : vector<1x128xf32> to vector<2x128xf32>
    %180 = arith.mulf %178, %179 : vector<2x128xf32>
    %181 = arith.addf %175, %180 : vector<2x128xf32>
    %c0_14 = arith.constant 0 : index
    %c0_15 = arith.constant 0 : index
    %182 = vector.load %arg8[%c0_14, %c0_15] : memref<2x128xf32, #tpu.memory_space<vmem>>, vector<2x128xf32>
    tpu.vector_store %arg8[%c0_14, %c0_15], %181 {strides = array<i32>} : memref<2x128xf32, #tpu.memory_space<vmem>>, vector<2x128xf32>,
    return
  }
  func.func @transform_0(%arg0: i32) -> (i32, i32) {
    %c0_i32 = arith.constant 0 : i32
    %c0_i32_0 = arith.constant 0 : i32
    return %c0_i32, %arg0 : i32, i32
  }
  func.func @transform_1(%arg0: i32) -> (i32, i32) {
    %c0_i32 = arith.constant 0 : i32
    %c0_i32_0 = arith.constant 0 : i32
    %c0_i32_1 = arith.constant 0 : i32
    return %c0_i32, %c0_i32_0 : i32, i32
  }
  func.func @transform_2(%arg0: i32) -> (i32, i32) {
    %c0_i32 = arith.constant 0 : i32
    %c0_i32_0 = arith.constant 0 : i32
    %c0_i32_1 = arith.constant 0 : i32
    return %c0_i32, %c0_i32_0 : i32, i32
  }
  func.func @transform_3(%arg0: i32) -> (i32, i32) {
    %c0_i32 = arith.constant 0 : i32
    %c0_i32_0 = arith.constant 0 : i32
    %c0_i32_1 = arith.constant 0 : i32
    return %c0_i32, %c0_i32_0 : i32, i32
  }
  func.func @transform_4(%arg0: i32) -> (i32, i32) {
    %c0_i32 = arith.constant 0 : i32
    %c0_i32_0 = arith.constant 0 : i32
    %c0_i32_1 = arith.constant 0 : i32
    return %c0_i32, %c0_i32_0 : i32, i32
  }
  func.func @transform_5(%arg0: i32) -> (i32, i32) {
    %c0_i32 = arith.constant 0 : i32
    %c0_i32_0 = arith.constant 0 : i32
    %c0_i32_1 = arith.constant 0 : i32
    return %c0_i32, %c0_i32_0 : i32, i32
  }
  func.func @transform_6(%arg0: i32) -> (i32, i32) {
    %c0_i32 = arith.constant 0 : i32
    %c0_i32_0 = arith.constant 0 : i32
    %c0_i32_1 = arith.constant 0 : i32
    return %c0_i32, %c0_i32_0 : i32, i32
  }
  func.func @transform_7(%arg0: i32) -> (i32, i32) {
    %c0_i32 = arith.constant 0 : i32
    %c0_i32_0 = arith.constant 0 : i32
    return %c0_i32, %arg0 : i32, i32
  }
}

</mosaic_0001>

<bundles_post_ra>
// kernel: tpu_custom_call.1
= control target key start
LH: loop header
LB: loop body
LE: loop exit
PB: predicated region body
PF: predicated region fallthrough
CT: control target
= control target key end

     0   :  { %v457_v2 = vmov 2   ;;  %v458_v3 = vmov 0   ;;  %s620_s0 = inlined_call_operand.vmem [shape: f32[4,128], index: 0, kind: input, shape index: {}]   ;;  %s621_s1 = inlined_call_operand.vmem [shape: f32[16,4], index: 1, kind: input, shape index: {}]   ;;  %s622_s2 = inlined_call_operand.vmem [shape: f32[16,1], index: 2, kind: input, shape index: {}]   ;;  %s623_s3 = inlined_call_operand.vmem [shape: f32[8,16], index: 3, kind: input, shape index: {}]   ;;  %s624_s4 = inlined_call_operand.vmem [shape: f32[8,1], index: 4, kind: input, shape index: {}]   ;;  %s625_s5 = inlined_call_operand.vmem [shape: f32[2,8], index: 5, kind: input, shape index: {}]   ;;  %s626_s6 = inlined_call_operand.vmem [shape: f32[2,1], index: 6, kind: input, shape index: {}]   ;;  %s627_s7 = inlined_call_operand.hbm [shape: f32[2,128], index: 7, kind: output, shape index: {}]  }
   0x1   :  { %v46_v0 = vld [vmem:[%s622_s2] sm:$0xff]  ;;  %401 = vset.pattern.permute.xlu0 %v457_v2  ;;  %399 = vset.pattern.permute.xlu1 %v458_v3 }
   0x2   :  { %v28_v1 = vld [vmem:[%s621_s1] sm:$0xff]  ;;  %50 = vperm.xlu1 %399, %v46_v0  }
   0x3   :  { %77 = vperm.xlu0 %401, %v28_v1  }
   0x4   :  { %12 = vsyncpa [#allocation3], 0  ;;  %v459_v4 = vmov 1   ;;  %v29_v5 = vld [vmem:[%s621_s1 + $0x8] sm:$0xff]  ;;  %v460_v6 = vmov 3   ;;  %v121_v7 = vld [vmem:[%s624_s4] sm:$0xff]  ;;  %v40_v24 = vlaneseq }
   0x5   :  { %v110_v8 = vld [vmem:[%s623_s3] sm:$0xff]  ;;  %v47_v9 = vld [vmem:[%s622_s2 + $0x8] sm:$0xff]  ;;  %v461_v10 = vmov 5   ;;  %v462_v11 = vmov 8   ;;  %v463_v12 = vmov 11   ;;  %v464_v13 = vmov 14  }
   0x6   :  { %400 = vset.pattern.permute.xlu1 %v459_v4  ;;  %v465_v14 = vmov 4   ;;  %v290_v15 = vld [vmem:[%s626_s6] sm:$0x3]  ;;  %v466_v16 = vmov 6   ;;  %v467_v18 = vmov 7   ;;  %v468_v19 = vmov 9  }
   0x7   :  { %402 = vset.pattern.permute.xlu0 %v458_v3  ;;  %61 = vperm.xlu1 %400, %v28_v1   ;;  %v279_v17 = vld [vmem:[%s625_s5] sm:$0x3]  ;;  %v469_v20 = vmov 10   ;;  %v470_v21 = vmov 12   ;;  %v471_v22 = vmov 13   ;;  %v472_v23 = vmov 15  }
   0x8   :  { %32 = vperm.xlu0 %402, %v28_v1   ;;  %v551_v25 = vshrl.u32 %v40_v24, 7  ;;  %v27_v27 = vld [vmem:[%s620_s0] sm:$0xf]  ;;  %s473_s0 = smov [#allocation2]  }
   0x9   :  { %s374_s13 = sshll.u32 %s473_s0, 4  ;;  %s375_s13 = int_to_ptr.vmem [resolvable:$true] %s374_s13 }
   0xa   :  { %v554_v26 = vsub.s32 0, %v551_v25  ;;  %v560_v30 = vsub.s32 1, %v551_v25  ;;  %v564_v32 = vsub.s32 2, %v551_v25  ;;  %v569_v38 = vsub.s32 3, %v551_v25  ;;  %s433_s14 = scalar_lea.vmem %s375_s13, 32  ;;  %p438_p1 = scmp.lt.s32.totalorder %s375_s13, %s375_s13 }
   0xb   :  { %403 = vset.pattern.permute.xlu1 %v460_v6  ;;  %p434_p0 = scmp.ne.s32.totalorder %s375_s13, %s433_s14  ;;  %p439_p2 = scmp.lt.s32.totalorder %s433_s14, %s433_s14 }
   0xc   :  { %37 = vperm.xlu0 %402, %v29_v5   ;;  %93 = vperm.xlu1 %403, %v28_v1   ;;  %v43_v31 = vrot.slane %v27_v27, %v554_v26  ;;  %v71_v35 = vrot.slane %v27_v27, %v560_v30  ;;  %v87_v37 = vrot.slane %v27_v27, %v564_v32 }
   0xd   :  { %v103_v44 = vrot.slane %v27_v27, %v569_v38  ;;  %p440_p3 = por %p439_p2, %p438_p1 }
   0xf   :  { %p441_p4 = pnand %p440_p3, %p434_p0 }
  0x10   :  { %124 = vperm.xlu0 %402, %v121_v7   ;;  %404 = vset.pattern.permute.xlu1 %v458_v3 }
  0x11   :  { %113 = vperm.xlu1 %404, %v110_v8  }
  0x14   :  { %407 = vset.pattern.permute.xlu0 %v459_v4 }
  0x15   :  { %65 = vperm.xlu0 %407, %v29_v5   ;;  %405 = vset.pattern.permute.xlu1 %v459_v4 }
  0x16   :  { %129 = vperm.xlu1 %405, %v110_v8  }
  0x19   :  { %409 = vset.pattern.permute.xlu0 %v460_v6 }
  0x1a   :  { %149 = vperm.xlu0 %409, %v110_v8   ;;  %406 = vset.pattern.permute.xlu1 %v458_v3 }
  0x1b   :  { %55 = vperm.xlu1 %406, %v47_v9  }
  0x1e   :  { %412 = vset.pattern.permute.xlu0 %v461_v10 }
  0x1f   :  { %169 = vperm.xlu0 %412, %v110_v8   ;;  %408 = vset.pattern.permute.xlu1 %v457_v2 }
  0x20   :  { %139 = vperm.xlu1 %408, %v110_v8  }
  0x23   :  { %415 = vset.pattern.permute.xlu0 %v462_v11 }
  0x24   :  { %199 = vperm.xlu0 %415, %v110_v8   ;;  %81 = vperm.xlu1 %408, %v29_v5  }
  0x28   :  { %418 = vset.pattern.permute.xlu0 %v463_v12  ;;  %410 = vset.pattern.permute.xlu1 %v460_v6 }
  0x29   :  { %229 = vperm.xlu0 %418, %v110_v8   ;;  %97 = vperm.xlu1 %410, %v29_v5   ;;  %v576_v5 = vsub.s32 4, %v551_v25 }
  0x2d   :  { %421 = vset.pattern.permute.xlu0 %v464_v13  ;;  %411 = vset.pattern.permute.xlu1 %v465_v14 }
  0x2e   :  { %259 = vperm.xlu0 %421, %v110_v8   ;;  %159 = vperm.xlu1 %411, %v110_v8  }
  0x32   :  { %424 = vset.pattern.permute.xlu0 %v458_v3  ;;  %413 = vset.pattern.permute.xlu1 %v466_v16 }
  0x33   :  { %293 = vperm.xlu0 %424, %v290_v15   ;;  %179 = vperm.xlu1 %413, %v110_v8  }
  0x37   :  { %427 = vset.pattern.permute.xlu0 %v460_v6  ;;  %414 = vset.pattern.permute.xlu1 %v467_v18 }
  0x38   :  { %318 = vperm.xlu0 %427, %v279_v17   ;;  %189 = vperm.xlu1 %414, %v110_v8  }
  0x3c   :  { %430 = vset.pattern.permute.xlu0 %v466_v16  ;;  %416 = vset.pattern.permute.xlu1 %v468_v19  ;;  %v584_v19 = vsub.s32 6, %v551_v25 }
  0x3d   :  { %348 = vperm.xlu0 %430, %v279_v17   ;;  %209 = vperm.xlu1 %416, %v110_v8  }
  0x41   :  { %432 = vset.pattern.permute.xlu0 %v467_v18  ;;  %417 = vset.pattern.permute.xlu1 %v469_v20 }
  0x42   :  { %219 = vperm.xlu1 %417, %v110_v8  }
  0x46   :  { %419 = vset.pattern.permute.xlu1 %v470_v21 }
  0x47   :  { %239 = vperm.xlu1 %419, %v110_v8  }
  0x4b   :  { %420 = vset.pattern.permute.xlu1 %v471_v22 }
  0x4c   :  { %249 = vperm.xlu1 %420, %v110_v8  }
  0x50   :  { %422 = vset.pattern.permute.xlu1 %v472_v23 }
  0x51   :  { %269 = vperm.xlu1 %422, %v110_v8  }
  0x55   :  { %423 = vset.pattern.permute.xlu1 %v458_v3 }
  0x56   :  { %282 = vperm.xlu1 %423, %v279_v17  }
  0x5a   :  { %425 = vset.pattern.permute.xlu1 %v459_v4 }
  0x5b   :  { %298 = vperm.xlu1 %425, %v279_v17  }
  0x5f   :  { %426 = vset.pattern.permute.xlu1 %v457_v2 }
  0x60   :  { %308 = vperm.xlu1 %426, %v279_v17  }
  0x64   :  { %428 = vset.pattern.permute.xlu1 %v465_v14 }
  0x65   :  { %328 = vperm.xlu1 %428, %v279_v17  }
  0x69   :  { %429 = vset.pattern.permute.xlu1 %v461_v10  ;;  %v580_v10 = vsub.s32 5, %v551_v25 }
  0x6a   :  { %338 = vperm.xlu1 %429, %v279_v17  }
  0x6e   :  { %431 = vset.pattern.permute.xlu1 %v467_v18 }
  0x6f   :  { %358 = vperm.xlu1 %431, %v279_v17  }
  0x81   :  { %v51_v28 = vpop.permute.xlu1 %50 }
  0x82   :  { %v78_v29 = vpop.permute.xlu0 %77 }
  0x83   :  { %v88_v42 = vmul.f32 %v87_v37, %v78_v29  ;;  %v589_v29 = vsub.s32 7, %v551_v25 }
  0x86   :  { %v62_v34 = vpop.permute.xlu1 %61 }
  0x87   :  { %v33_v33 = vpop.permute.xlu0 %32  ;;  %v72_v40 = vmul.f32 %v71_v35, %v62_v34 }
  0x88   :  { %v44_v36 = vmul.f32 %v43_v31, %v33_v33 }
  0x8a   :  { %v58_v39 = vadd.f32 %v51_v28, %v44_v36 }
  0x8b   :  { %v94_v41 = vpop.permute.xlu1 %93  ;;  %v38_v50 = vpop.permute.xlu0 %37 }
  0x8c   :  { %v74_v43 = vadd.f32 %v72_v40, %v58_v39  ;;  %v104_v46 = vmul.f32 %v103_v44, %v94_v41  ;;  %v45_v60 = vmul.f32 %v43_v31, %v38_v50 }
  0x8e   :  { %v90_v45 = vadd.f32 %v88_v42, %v74_v43 }
  0x8f   :  { %v125_v54 = vpop.permute.xlu0 %124 }
  0x90   :  { %v114_v47 = vpop.permute.xlu1 %113  ;;  %v106_v48 = vadd.f32 %v104_v46, %v90_v45 }
  0x92   :  { %v108_v51 = vmax.f32 %v106_v48, 0.0 }
  0x94   :  { %v119_v53 = vrot.slane %v108_v51, %v554_v26  ;;  %v135_v57 = vrot.slane %v108_v51, %v560_v30  ;;  %v66_v58 = vpop.permute.xlu0 %65  ;;  %v145_v63 = vrot.slane %v108_v51, %v564_v32  ;;  %v155_v7 = vrot.slane %v108_v51, %v569_v38 }
  0x95   :  { %v130_v49 = vpop.permute.xlu1 %129  ;;  %v73_v1 = vmul.f32 %v71_v35, %v66_v58  ;;  %v165_v14 = vrot.slane %v108_v51, %v576_v5  ;;  %v175_v21 = vrot.slane %v108_v51, %v580_v10  ;;  %v185_v28 = vrot.slane %v108_v51, %v584_v19 }
  0x96   :  { %v120_v56 = vmul.f32 %v119_v53, %v114_v47  ;;  %v136_v62 = vmul.f32 %v135_v57, %v130_v49  ;;  %v195_v35 = vrot.slane %v108_v51, %v589_v29 }
  0x98   :  { %v127_v61 = vadd.f32 %v125_v54, %v120_v56 }
  0x99   :  { %v150_v6 = vpop.permute.xlu0 %149 }
  0x9a   :  { %v56_v52 = vpop.permute.xlu1 %55  ;;  %v137_v2 = vadd.f32 %v136_v62, %v127_v61  ;;  %v156_v11 = vmul.f32 %v155_v7, %v150_v6 }
  0x9b   :  { %v59_v3 = vadd.f32 %v56_v52, %v45_v60 }
  0x9d   :  { %v75_v12 = vadd.f32 %v73_v1, %v59_v3 }
  0x9e   :  { %v170_v20 = vpop.permute.xlu0 %169 }
  0x9f   :  { %v140_v55 = vpop.permute.xlu1 %139  ;;  %v176_v24 = vmul.f32 %v175_v21, %v170_v20 }
  0xa0   :  { %v146_v0 = vmul.f32 %v145_v63, %v140_v55 }
  0xa2   :  { %v147_v8 = vadd.f32 %v146_v0, %v137_v2 }
  0xa3   :  { %v82_v59 = vpop.permute.xlu1 %81  ;;  %v200_v42 = vpop.permute.xlu0 %199 }
  0xa4   :  { %v89_v9 = vmul.f32 %v87_v37, %v82_v59  ;;  %v157_v17 = vadd.f32 %v156_v11, %v147_v8 }
  0xa6   :  { %v91_v16 = vadd.f32 %v89_v9, %v75_v12 }
  0xa8   :  { %v98_v4 = vpop.permute.xlu1 %97  ;;  %v230_v53 = vpop.permute.xlu0 %229 }
  0xa9   :  { %v105_v13 = vmul.f32 %v103_v44, %v98_v4 }
  0xab   :  { %v107_v22 = vadd.f32 %v105_v13, %v91_v16 }
  0xad   :  { %v160_v15 = vpop.permute.xlu1 %159  ;;  %v109_v31 = vmax.f32 %v107_v22, 0.0  ;;  %v260_v61 = vpop.permute.xlu0 %259 }
  0xae   :  { %v166_v18 = vmul.f32 %v165_v14, %v160_v15 }
  0xaf   :  { %v205_v40 = vrot.slane %v109_v31, %v554_v26  ;;  %v215_v45 = vrot.slane %v109_v31, %v560_v30  ;;  %v225_v25 = vrot.slane %v109_v31, %v564_v32  ;;  %v235_v49 = vrot.slane %v109_v31, %v569_v38 }
  0xb0   :  { %v167_v23 = vadd.f32 %v166_v18, %v157_v17  ;;  %v245_v56 = vrot.slane %v109_v31, %v576_v5  ;;  %v265_v59 = vrot.slane %v109_v31, %v584_v19  ;;  %v255_v60 = vrot.slane %v109_v31, %v580_v10 }
  0xb1   :  { %v206_v44 = vmul.f32 %v205_v40, %v200_v42  ;;  %v236_v54 = vmul.f32 %v235_v49, %v230_v53  ;;  %v275_v3 = vrot.slane %v109_v31, %v589_v29 }
  0xb2   :  { %v180_v27 = vpop.permute.xlu1 %179  ;;  %v177_v33 = vadd.f32 %v176_v24, %v167_v23  ;;  %v266_v1 = vmul.f32 %v265_v59, %v260_v61  ;;  %v294_v16 = vpop.permute.xlu0 %293 }
  0xb3   :  { %v186_v34 = vmul.f32 %v185_v28, %v180_v27 }
  0xb5   :  { %v187_v37 = vadd.f32 %v186_v34, %v177_v33 }
  0xb7   :  { %v190_v36 = vpop.permute.xlu1 %189  ;;  %v319_v28 = vpop.permute.xlu0 %318 }
  0xb8   :  { %v196_v39 = vmul.f32 %v195_v35, %v190_v36 }
  0xba   :  { %v197_v41 = vadd.f32 %v196_v39, %v187_v37 }
  0xbc   :  { %v210_v43 = vpop.permute.xlu1 %209  ;;  %v207_v46 = vadd.f32 %v206_v44, %v197_v41  ;;  %v349_v37 = vpop.permute.xlu0 %348 }
  0xbd   :  { %v216_v47 = vmul.f32 %v215_v45, %v210_v43 }
  0xbf   :  { %v217_v50 = vadd.f32 %v216_v47, %v207_v46 }
  0xc1   :  { %v220_v48 = vpop.permute.xlu1 %219 }
  0xc2   :  { %v226_v51 = vmul.f32 %v225_v25, %v220_v48 }
  0xc4   :  { %v227_v52 = vadd.f32 %v226_v51, %v217_v50 }
  0xc6   :  { %v240_v55 = vpop.permute.xlu1 %239  ;;  %v237_v57 = vadd.f32 %v236_v54, %v227_v52 }
  0xc7   :  { %v246_v58 = vmul.f32 %v245_v56, %v240_v55 }
  0xc9   :  { %v247_v63 = vadd.f32 %v246_v58, %v237_v57 }
  0xcb   :  { %v250_v62 = vpop.permute.xlu1 %249 }
  0xcc   :  { %v256_v0 = vmul.f32 %v255_v60, %v250_v62 }
  0xce   :  { %v257_v2 = vadd.f32 %v256_v0, %v247_v63 }
  0xd0   :  { %v270_v4 = vpop.permute.xlu1 %269  ;;  %v267_v6 = vadd.f32 %v266_v1, %v257_v2 }
  0xd1   :  { %v276_v7 = vmul.f32 %v275_v3, %v270_v4 }
  0xd3   :  { %v277_v8 = vadd.f32 %v276_v7, %v267_v6 }
  0xd5   :  { %v278_v9 = vmax.f32 %v277_v8, 0.0  ;;  %v283_v11 = vpop.permute.xlu1 %282 }
  0xd7   :  { %v288_v12 = vrot.slane %v278_v9, %v554_v26  ;;  %v304_v15 = vrot.slane %v278_v9, %v560_v30  ;;  %v314_v20 = vrot.slane %v278_v9, %v564_v32  ;;  %v324_v22 = vrot.slane %v278_v9, %v569_v38 }
  0xd8   :  { %v334_v26 = vrot.slane %v278_v9, %v576_v5  ;;  %v354_v30 = vrot.slane %v278_v9, %v584_v19  ;;  %v344_v36 = vrot.slane %v278_v9, %v580_v10  ;;  %v364_v42 = vrot.slane %v278_v9, %v589_v29 }
  0xd9   :  { %v289_v13 = vmul.f32 %v288_v12, %v283_v11  ;;  %v325_v31 = vmul.f32 %v324_v22, %v319_v28 }
  0xda   :  { %v299_v14 = vpop.permute.xlu1 %298  ;;  %v355_v41 = vmul.f32 %v354_v30, %v349_v37 }
  0xdb   :  { %v296_v17 = vadd.f32 %v294_v16, %v289_v13  ;;  %v305_v18 = vmul.f32 %v304_v15, %v299_v14 }
  0xdd   :  { %v306_v23 = vadd.f32 %v305_v18, %v296_v17 }
  0xdf   :  { %v309_v21 = vpop.permute.xlu1 %308 }
  0xe0   :  { %v315_v24 = vmul.f32 %v314_v20, %v309_v21 }
  0xe2   :  { %v316_v27 = vadd.f32 %v315_v24, %v306_v23 }
  0xe4   :  { %v329_v33 = vpop.permute.xlu1 %328  ;;  %v326_v34 = vadd.f32 %v325_v31, %v316_v27 }
  0xe5   :  { %v335_v35 = vmul.f32 %v334_v26, %v329_v33 }
  0xe7   :  { %v336_v32 = vadd.f32 %v335_v35, %v326_v34 }
  0xe9   :  { %v339_v39 = vpop.permute.xlu1 %338 }
  0xea   :  { %v345_v40 = vmul.f32 %v344_v36, %v339_v39 }
  0xec   :  { %v346_v38 = vadd.f32 %v345_v40, %v336_v32 }
  0xee   :  { %v359_v43 = vpop.permute.xlu1 %358  ;;  %v356_v44 = vadd.f32 %v355_v41, %v346_v38 }
  0xef   :  { %v365_v45 = vmul.f32 %v364_v42, %v359_v43 }
  0xf1   :  { %v366_v5 = vadd.f32 %v365_v45, %v356_v44 }
  0xf3   :  { %367 = vst [vmem:[#allocation2] sm:$0x3] %v366_v5 }
  0xf4   :  { %444 = shalt.err (!%p441_p4)
}
  0xf5   :  { %s445_s17 = scalar_lea.hbm %s627_s7, 32 }
  0xf6   :  { %p446_p5 = scmp.ne.s32.totalorder %s627_s7, %s445_s17  ;;  %p449_p6 = scmp.lt.u32.totalorder %s445_s17, %s627_s7 }
  0xf8   :  { %p451_p7 = pnand %p449_p6, %p446_p5 }
  0xfa   :  { %454 = shalt.err (!%p451_p7)
}
  0xfb   :  { %377 = dma.vmem_to_hbm [thread:$0]  %s375_s13, 32, %s627_s7, [#allocation3]  }
  0xfc   :  { %455 = dma.done.wait [#allocation3], 32  }
  0xfd   :  { %456 = vsyncadd [#allocation3], 4294967264 }
  0xfe   :  { %381 = vsyncpa [#allocation3], 1 }

</bundles_post_ra>
